<compile_context>
chip_gen: v6e
topology: v6e:2x2x1
jax: 0.10.0
libtpu: 0.0.40
codegen_flags: <defaults>
</compile_context>

<pallas_src>
import math
import functools

import jax
import jax.numpy as jnp
from jax.experimental import pallas as pl
from jax.experimental.pallas import tpu as pltpu

EPS = 1e-12

# --------------------------- generation-aware sizing ---------------------------

_VMEM_CAP_CACHE = None


def _vmem_cap():
    """Physical VMEM capacity (bytes); falls back to 128 MiB if unknown."""
    global _VMEM_CAP_CACHE
    if _VMEM_CAP_CACHE is None:
        cap = 128 * 1024 * 1024
        try:
            info = pltpu.get_tpu_info()
            cap = int(getattr(info, "vmem_capacity_bytes", cap))
        except Exception:
            pass
        _VMEM_CAP_CACHE = cap
    return _VMEM_CAP_CACHE


def _vmem_limit_bytes():
    # v7x-class parts have 64 MiB/core: leave headroom for compiler scratch.
    if _vmem_cap() <= 64 * 1024 * 1024:
        return 40 * 1024 * 1024
    return 64 * 1024 * 1024


def _ffn_col_limit():
    # Bigger FFN I-tiles on 128 MiB parts (v5e/v6e), capped at 1024 on v7x.
    return 1024 if _vmem_cap() <= 64 * 1024 * 1024 else 2048


def _mosaic(semantics):
    return pltpu.CompilerParams(dimension_semantics=semantics,
                                vmem_limit_bytes=_vmem_limit_bytes())


def _round_up(x, m):
    return ((x + m - 1) // m) * m


def _row_tile(rows):
    limit = 256 if _vmem_cap() <= 64 * 1024 * 1024 else 512
    if rows <= limit:
        return _round_up(rows, 8)
    for cand in (512, 448, 384, 320, 256, 192, 128, 64, 32, 16, 8):
        if cand <= limit and rows % cand == 0:
            return cand
    return limit                      # rows get padded to a multiple of this


def _pad_rows(x2d, tr):
    """Pad the leading (row) dim up to a multiple of the tile; return (x, Rp)."""
    R = x2d.shape[0]
    Rp = _round_up(R, tr)
    if Rp != R:
        x2d = jnp.pad(x2d, ((0, Rp - R), (0, 0)))
    return x2d, Rp


def _col_tile(cols, limit):
    if cols <= limit:
        return cols
    for cand in (2048, 1536, 1024, 768, 512, 384, 256, 128):
        if cand <= limit and cols % cand == 0:
            return cand
    return cols   # fallback: single block (only hit for very odd inter_size)


def _q_tile(S, limit=256):
    if S <= limit:
        return S
    for cand in (256, 192, 128, 64, 32, 16, 8):
        if S % cand == 0:
            return cand
    return S


# ----------------------------- in-kernel helpers -----------------------------

def _gelu(x):
    # tanh-form GELU so the transcendental runs on the EUP slot.
    # TODO(synk): reference uses exact erf-GELU; tanh form differs by <~3e-3
    # (inside bf16-matmul noise).  Swap in an erf path if bit parity is needed.
    c = math.sqrt(2.0 / math.pi)
    return 0.5 * x * (1.0 + jnp.tanh(c * (x + 0.044715 * x * x * x)))


def _layernorm(x, gamma, beta, eps=EPS):
    u = jnp.mean(x, axis=-1, keepdims=True)
    s = jnp.mean((x - u) ** 2, axis=-1, keepdims=True)
    xn = (x - u) * jax.lax.rsqrt(s + eps)          # rsqrt -> EUP
    return gamma * xn + beta


def _qkv_projections(xb, wq_ref, wk_ref, wv_ref, bq_ref, bk_ref, bv_ref):
    def proj(w_ref, b_ref):
        acc = jnp.dot(xb, w_ref[...], preferred_element_type=jnp.float32)
        return (acc + b_ref[...]).astype(jnp.bfloat16)
    return (proj(wq_ref, bq_ref), proj(wk_ref, bk_ref), proj(wv_ref, bv_ref))


# ------------------------------- Pallas kernels -------------------------------

def _layernorm_kernel(x_ref, g_ref, b_ref, o_ref):
    x = x_ref[...].astype(jnp.float32)
    o_ref[...] = _layernorm(x, g_ref[...], b_ref[...]).astype(o_ref.dtype)


def layernorm_pallas(x2d, gamma, beta):
    """Standalone LN (only used when no encoder layer runs); bf16 out."""
    R, H = x2d.shape
    tr = _row_tile(R)
    xp, Rp = _pad_rows(x2d, tr)
    out = pl.pallas_call(
        _layernorm_kernel,
        out_shape=jax.ShapeDtypeStruct((Rp, H), jnp.bfloat16),
        grid=(Rp // tr,),
        in_specs=[pl.BlockSpec((tr, H), lambda r: (r, 0)),
                  pl.BlockSpec((1, H), lambda r: (0, 0)),
                  pl.BlockSpec((1, H), lambda r: (0, 0))],
        out_specs=pl.BlockSpec((tr, H), lambda r: (r, 0)),
        compiler_params=_mosaic(("parallel",)),
    )(xp, gamma, beta)
    return out[:R]


def _qkv_kernel(x_ref, wq_ref, wk_ref, wv_ref, bq_ref, bk_ref, bv_ref,
                q_o, k_o, v_o):
    xb = x_ref[...]                                  # bf16 (tr, H)
    q, k, v = _qkv_projections(xb, wq_ref, wk_ref, wv_ref,
                               bq_ref, bk_ref, bv_ref)
    q_o[...] = q
    k_o[...] = k
    v_o[...] = v


def qkv_pallas(x2d, wq, wk, wv, bq, bk, bv):
    """(R, H) bf16 -> Q, K, V each (R, H) bf16 (input already LayerNormed)."""
    R, H = x2d.shape
    tr = _row_tile(R)
    xp, Rp = _pad_rows(x2d, tr)
    outs = pl.pallas_call(
        _qkv_kernel,
        out_shape=tuple(jax.ShapeDtypeStruct((Rp, H), jnp.bfloat16)
                        for _ in range(3)),
        grid=(Rp // tr,),
        in_specs=[pl.BlockSpec((tr, H), lambda r: (r, 0))]
                 + [pl.BlockSpec((H, H), lambda r: (0, 0))] * 3
                 + [pl.BlockSpec((1, H), lambda r: (0, 0))] * 3,
        out_specs=tuple(pl.BlockSpec((tr, H), lambda r: (r, 0))
                        for _ in range(3)),
        compiler_params=_mosaic(("parallel",)),
    )(xp, wq, wk, wv, bq, bk, bv)
    return tuple(o[:R] for o in outs)


def _emb_ln_qkv_kernel(x_ref, g_ref, b_ref,
                       wq_ref, wk_ref, wv_ref, bq_ref, bk_ref, bv_ref,
                       xn_o, q_o, k_o, v_o):
    xn = _layernorm(x_ref[...].astype(jnp.float32), g_ref[...], b_ref[...])
    xb = xn.astype(jnp.bfloat16)
    xn_o[...] = xb                                    # post-LN residual, bf16
    q, k, v = _qkv_projections(xb, wq_ref, wk_ref, wv_ref,
                               bq_ref, bk_ref, bv_ref)
    q_o[...] = q
    k_o[...] = k
    v_o[...] = v


def emb_ln_qkv_pallas(x2d, ln_g, ln_b, wq, wk, wv, bq, bk, bv):
    """Embedding LayerNorm fused into the first layer's QKV projection."""
    R, H = x2d.shape
    tr = _row_tile(R)
    xp, Rp = _pad_rows(x2d, tr)
    outs = pl.pallas_call(
        _emb_ln_qkv_kernel,
        out_shape=tuple(jax.ShapeDtypeStruct((Rp, H), jnp.bfloat16)
                        for _ in range(4)),
        grid=(Rp // tr,),
        in_specs=[pl.BlockSpec((tr, H), lambda r: (r, 0)),
                  pl.BlockSpec((1, H), lambda r: (0, 0)),
                  pl.BlockSpec((1, H), lambda r: (0, 0))]
                 + [pl.BlockSpec((H, H), lambda r: (0, 0))] * 3
                 + [pl.BlockSpec((1, H), lambda r: (0, 0))] * 3,
        out_specs=tuple(pl.BlockSpec((tr, H), lambda r: (r, 0))
                        for _ in range(4)),
        compiler_params=_mosaic(("parallel",)),
    )(xp, ln_g, ln_b, wq, wk, wv, bq, bk, bv)
    return tuple(o[:R] for o in outs)


def _attn_core_kernel(x_ref, q_ref, k_ref, v_ref, mask_ref,
                      wo_ref, bo_ref, g_ref, beta_ref, o_ref,
                      *, n_head, scale):
    q = q_ref[0]                                      # (tq, H) bf16
    k = k_ref[0]                                      # (S,  H) bf16
    v = v_ref[0]                                      # (S,  H) bf16
    neg = (1.0 - mask_ref[0]) * -10000.0              # (1, S) f32 key bias
    hs = q.shape[-1] // n_head

    # All heads handled inside one grid step (no per-head grid overhead);
    # per-head score/softmax/ctx via static lane slices, then a single
    # full-H output projection so the Wo matmul contracts over K = H.
    ctx_parts = []
    for h in range(n_head):
        sl = slice(h * hs, (h + 1) * hs)
        qh, kh, vh = q[:, sl], k[:, sl], v[:, sl]
        s = jax.lax.dot_general(qh, kh, (((1,), (1,)), ((), ())),
                                preferred_element_type=jnp.float32)
        s = s * scale + neg
        s = s - jnp.max(s, axis=-1, keepdims=True)
        e = jnp.exp(s)
        prob = e * pl.reciprocal(jnp.sum(e, axis=-1, keepdims=True),
                                 approx=True)          # EUP reciprocal
        ctx_parts.append(jnp.dot(prob.astype(jnp.bfloat16), vh,
                                 preferred_element_type=jnp.float32))
    ctx = jnp.concatenate(ctx_parts, axis=-1)          # (tq, H) f32

    att = jnp.dot(ctx.astype(jnp.bfloat16), wo_ref[...],
                  preferred_element_type=jnp.float32) + bo_ref[...]
    xres = x_ref[0].astype(jnp.float32)                # post-LN input residual
    o_ref[0] = _layernorm(xres + att, g_ref[...], beta_ref[...]).astype(o_ref.dtype)


def attn_core_pallas(x, q, k, v, att_mask, wo, bo, ln_g, ln_b, n_head):
    """x/q/k/v: (B, S, H) bf16; mask: (B, 1, S) f32 key mask; bf16 output."""
    B, S, H = x.shape
    hs = H // n_head
    tq = _q_tile(S)
    kernel = functools.partial(_attn_core_kernel, n_head=n_head,
                               scale=1.0 / math.sqrt(hs))
    return pl.pallas_call(
        kernel,
        out_shape=jax.ShapeDtypeStruct((B, S, H), jnp.bfloat16),
        grid=(B, S // tq),
        in_specs=[pl.BlockSpec((1, tq, H), lambda b, qi: (b, qi, 0)),  # residual
                  pl.BlockSpec((1, tq, H), lambda b, qi: (b, qi, 0)),  # Q tile
                  pl.BlockSpec((1, S, H),  lambda b, qi: (b, 0, 0)),   # K (full)
                  pl.BlockSpec((1, S, H),  lambda b, qi: (b, 0, 0)),   # V (full)
                  pl.BlockSpec((1, 1, S),  lambda b, qi: (b, 0, 0)),   # key mask
                  pl.BlockSpec((H, H), lambda b, qi: (0, 0)),          # Wo
                  pl.BlockSpec((1, H), lambda b, qi: (0, 0)),          # bo
                  pl.BlockSpec((1, H), lambda b, qi: (0, 0)),          # ln gamma
                  pl.BlockSpec((1, H), lambda b, qi: (0, 0))],         # ln beta
        out_specs=pl.BlockSpec((1, tq, H), lambda b, qi: (b, qi, 0)),
        compiler_params=_mosaic(("parallel", "parallel")),
    )(x, q, k, v, att_mask, wo, bo, ln_g, ln_b)


def _ffn_kernel(y_ref, w1_ref, b1_ref, w2_ref, b2_ref, g_ref, beta_ref,
                o_ref, acc_ref):
    t = pl.program_id(1)

    @pl.when(t == 0)
    def _():
        acc_ref[...] = jnp.zeros_like(acc_ref)

    yb = y_ref[...]                                   # bf16 (tr, H), no upcast
    h1 = jnp.dot(yb, w1_ref[...], preferred_element_type=jnp.float32) + b1_ref[...]
    h1 = _gelu(h1)                                    # (tr, ti) f32
    acc_ref[...] += jnp.dot(h1.astype(jnp.bfloat16), w2_ref[...],
                            preferred_element_type=jnp.float32)

    @pl.when(t == pl.num_programs(1) - 1)
    def _():
        # residual upcast happens once, only in the finalize step
        out = acc_ref[...] + b2_ref[...] + y_ref[...].astype(jnp.float32)
        o_ref[...] = _layernorm(out, g_ref[...], beta_ref[...]).astype(o_ref.dtype)


def ffn_pallas(y2d, w1, b1, w2, b2, ln_g, ln_b):
    """Streams W1/W2 in I-tiles with an f32 accumulator; fused GELU + LN."""
    R, H = y2d.shape
    I = w1.shape[1]
    tr = _row_tile(R)
    yp, Rp = _pad_rows(y2d, tr)
    ti = _col_tile(I, _ffn_col_limit())
    out = pl.pallas_call(
        _ffn_kernel,
        out_shape=jax.ShapeDtypeStruct((Rp, H), jnp.bfloat16),
        grid=(Rp // tr, I // ti),
        in_specs=[pl.BlockSpec((tr, H), lambda r, t: (r, 0)),
                  pl.BlockSpec((H, ti), lambda r, t: (0, t)),
                  pl.BlockSpec((1, ti), lambda r, t: (0, t)),
                  pl.BlockSpec((ti, H), lambda r, t: (t, 0)),
                  pl.BlockSpec((1, H), lambda r, t: (0, 0)),
                  pl.BlockSpec((1, H), lambda r, t: (0, 0)),
                  pl.BlockSpec((1, H), lambda r, t: (0, 0))],
        out_specs=pl.BlockSpec((tr, H), lambda r, t: (r, 0)),
        scratch_shapes=[pltpu.VMEM((tr, H), jnp.float32)],
        compiler_params=_mosaic(("parallel", "arbitrary")),
    )(yp, w1, b1, w2, b2, ln_g, ln_b)
    return out[:R]


# ----------------------------- params & forward ------------------------------

def init_params(key, config):
    H = config['hidden_size']
    I = config['intermediate_size']
    L = config['num_hidden_layers']
    ks = jax.random.split(key, 3 + L)

    def normal(k, shape):
        return (0.02 * jax.random.normal(k, shape)).astype(jnp.float32)

    token_table = normal(ks[0], (config['vocab_size'], H)).at[0].set(0.0)  # padding_idx=0
    position_table = normal(ks[1], (config['max_position_embeddings'], H))
    segment_table = normal(ks[2], (config['type_vocab_size'], H))

    layers = []
    for li in range(L):
        lk = jax.random.split(ks[3 + li], 6)
        layers.append(dict(
            # matmul weights stored in bf16 (MXU-native); biases / LN in f32
            Wq=normal(lk[0], (H, H)).astype(jnp.bfloat16),
            Wk=normal(lk[1], (H, H)).astype(jnp.bfloat16),
            Wv=normal(lk[2], (H, H)).astype(jnp.bfloat16),
            Wo=normal(lk[3], (H, H)).astype(jnp.bfloat16),
            bq=jnp.zeros((1, H), jnp.float32), bk=jnp.zeros((1, H), jnp.float32),
            bv=jnp.zeros((1, H), jnp.float32), bo=jnp.zeros((1, H), jnp.float32),
            ln1_g=jnp.ones((1, H), jnp.float32), ln1_b=jnp.zeros((1, H), jnp.float32),
            W1=normal(lk[4], (H, I)).astype(jnp.bfloat16),
            b1=jnp.zeros((1, I), jnp.float32),
            W2=normal(lk[5], (I, H)).astype(jnp.bfloat16),
            b2=jnp.zeros((1, H), jnp.float32),
            ln2_g=jnp.ones((1, H), jnp.float32), ln2_b=jnp.zeros((1, H), jnp.float32)))

    return dict(token_table=token_table, position_table=position_table,
                segment_table=segment_table,
                ln_emb_g=jnp.ones((1, H), jnp.float32),
                ln_emb_b=jnp.zeros((1, H), jnp.float32),
                layers=layers)


def bert_forward(token, params, config, segment=None):
    """BERT.forward with n_label=None, eval mode (dropout = identity)."""
    # TODO(synk): dropout layers are stochastic; omitted (eval-mode semantics).
    B, S = token.shape
    H = config['hidden_size']
    n_head = config['num_attention_heads']
    if segment is None:
        segment = jnp.zeros_like(token)
    position = jnp.broadcast_to(jnp.arange(S, dtype=token.dtype)[None, :], (B, S))

    # Embedding gathers are plain-JAX glue.
    em = (jnp.take(params['token_table'], token, axis=0)
          + jnp.take(params['position_table'], position, axis=0)
          + jnp.take(params['segment_table'], segment, axis=0))      # (B,S,H) f32

    att_mask = (token != 0).astype(jnp.float32).reshape(B, 1, S)     # key mask

    # n_label is None -> only sequence_out[-2] is consumed, so the final
    # encoder layer would be dead compute; skip it (bit-identical output).
    n_used = max(config['num_hidden_layers'] - 1, 0)

    if n_used == 0:
        x = layernorm_pallas(em.reshape(B * S, H),
                             params['ln_emb_g'], params['ln_emb_b']).reshape(B, S, H)
    else:
        x = None
        for li in range(n_used):
            p = params['layers'][li]
            if li == 0:
                # embedding LayerNorm fused into the first QKV projection
                xn2, q2, k2, v2 = emb_ln_qkv_pallas(
                    em.reshape(B * S, H), params['ln_emb_g'], params['ln_emb_b'],
                    p['Wq'], p['Wk'], p['Wv'], p['bq'], p['bk'], p['bv'])
            else:
                xn2 = x.reshape(B * S, H)
                q2, k2, v2 = qkv_pallas(xn2, p['Wq'], p['Wk'], p['Wv'],
                                        p['bq'], p['bk'], p['bv'])
            att = attn_core_pallas(xn2.reshape(B, S, H), q2.reshape(B, S, H),
                                   k2.reshape(B, S, H), v2.reshape(B, S, H),
                                   att_mask, p['Wo'], p['bo'],
                                   p['ln1_g'], p['ln1_b'], n_head)
            ffn = ffn_pallas(att.reshape(B * S, H), p['W1'], p['b1'],
                             p['W2'], p['b2'], p['ln2_g'], p['ln2_b'])
            x = ffn.reshape(B, S, H)

    # torch.mean(sequence_out[-2], dim=1): padded positions are included in the
    # pooled mean, matching the reference (mask is only used inside attention).
    return jnp.mean(x.astype(jnp.float32), axis=1)


# ------------------------------------ main ------------------------------------

if __name__ == "__main__":
    config = dict(vocab_size=50,
                  max_position_embeddings=16,
                  type_vocab_size=2,
                  hidden_size=32,
                  num_attention_heads=4,
                  hidden_dropout_prob=0.1,
                  intermediate_size=64,
                  num_hidden_layers=2)
    B, S = 2, 8

    key = jax.random.PRNGKey(0)
    k_tok, k_param = jax.random.split(key)

    token = jax.random.randint(k_tok, (B, S), 1, config['vocab_size'],
                               dtype=jnp.int32)
    token = token.at[1, -2:].set(0)   # padding tokens to exercise the mask

    params = init_params(k_param, config)

    out = bert_forward(token, params, config)
    out = jax.block_until_ready(out)
    assert out.shape == (B, config['hidden_size'])
    assert bool(jnp.all(jnp.isfinite(out)))
    print("KERNEL_OK")
</pallas_src>

<mosaic_0001>
module attributes {stable_mosaic.version = 11 : i64} {
  func.func @_emb_ln_qkv_kernel(%arg0: i32, %arg1: memref<16x32xf32, #tpu.memory_space<vmem>>, %arg2: memref<1x32xf32, #tpu.memory_space<vmem>>, %arg3: memref<1x32xf32, #tpu.memory_space<vmem>>, %arg4: memref<32x32xbf16, #tpu.memory_space<vmem>>, %arg5: memref<32x32xbf16, #tpu.memory_space<vmem>>, %arg6: memref<32x32xbf16, #tpu.memory_space<vmem>>, %arg7: memref<1x32xf32, #tpu.memory_space<vmem>>, %arg8: memref<1x32xf32, #tpu.memory_space<vmem>>, %arg9: memref<1x32xf32, #tpu.memory_space<vmem>>, %arg10: memref<16x32xbf16, #tpu.memory_space<vmem>>, %arg11: memref<16x32xbf16, #tpu.memory_space<vmem>>, %arg12: memref<16x32xbf16, #tpu.memory_space<vmem>>, %arg13: memref<16x32xbf16, #tpu.memory_space<vmem>>) attributes {dimension_semantics = [#tpu.dimension_semantics<parallel>], iteration_bounds = array<i64: 1>, scalar_prefetch = 0 : i64, scratch_operands = 0 : i64, tpu.core_type = #tpu.core_type<tc>, window_params = [{transform_indices = @transform_0, window_bounds = array<i64: 16, 32>}, {pipeline_mode = #tpu.pipeline_mode<synchronous>, transform_indices = @transform_1, window_bounds = array<i64: 1, 32>}, {pipeline_mode = #tpu.pipeline_mode<synchronous>, transform_indices = @transform_2, window_bounds = array<i64: 1, 32>}, {pipeline_mode = #tpu.pipeline_mode<synchronous>, transform_indices = @transform_3, window_bounds = array<i64: 32, 32>}, {pipeline_mode = #tpu.pipeline_mode<synchronous>, transform_indices = @transform_4, window_bounds = array<i64: 32, 32>}, {pipeline_mode = #tpu.pipeline_mode<synchronous>, transform_indices = @transform_5, window_bounds = array<i64: 32, 32>}, {pipeline_mode = #tpu.pipeline_mode<synchronous>, transform_indices = @transform_6, window_bounds = array<i64: 1, 32>}, {pipeline_mode = #tpu.pipeline_mode<synchronous>, transform_indices = @transform_7, window_bounds = array<i64: 1, 32>}, {pipeline_mode = #tpu.pipeline_mode<synchronous>, transform_indices = @transform_8, window_bounds = array<i64: 1, 32>}, {transform_indices = @transform_9, window_bounds = array<i64: 16, 32>}, {transform_indices = @transform_10, window_bounds = array<i64: 16, 32>}, {transform_indices = @transform_11, window_bounds = array<i64: 16, 32>}, {transform_indices = @transform_12, window_bounds = array<i64: 16, 32>}]} {
    %c0 = arith.constant 0 : index
    %c0_0 = arith.constant 0 : index
    %0 = vector.load %arg1[%c0, %c0_0] : memref<16x32xf32, #tpu.memory_space<vmem>>, vector<16x32xf32>
    %c0_1 = arith.constant 0 : index
    %c0_2 = arith.constant 0 : index
    %1 = vector.load %arg2[%c0_1, %c0_2] : memref<1x32xf32, #tpu.memory_space<vmem>>, vector<1x32xf32>
    %c0_3 = arith.constant 0 : index
    %c0_4 = arith.constant 0 : index
    %2 = vector.load %arg3[%c0_3, %c0_4] : memref<1x32xf32, #tpu.memory_space<vmem>>, vector<1x32xf32>
    %cst = arith.constant dense<0.000000e+00> : vector<16xf32>
    %3 = vector.multi_reduction <add>, %0, %cst [1] : vector<16x32xf32> to vector<16xf32>
    %4 = vector.shape_cast %3 : vector<16xf32> to vector<16x1xf32>
    %cst_5 = arith.constant 3.200000e+01 : f32
    %5 = vector.broadcast %cst_5 : f32 to vector<16x1xf32>
    %6 = arith.divf %4, %5 : vector<16x1xf32>
    %7 = vector.broadcast %6 : vector<16x1xf32> to vector<16x32xf32>
    %8 = arith.subf %0, %7 : vector<16x32xf32>
    %9 = arith.mulf %8, %8 : vector<16x32xf32>
    %cst_6 = arith.constant dense<0.000000e+00> : vector<16xf32>
    %10 = vector.multi_reduction <add>, %9, %cst_6 [1] : vector<16x32xf32> to vector<16xf32>
    %11 = vector.shape_cast %10 : vector<16xf32> to vector<16x1xf32>
    %cst_7 = arith.constant 3.200000e+01 : f32
    %12 = vector.broadcast %cst_7 : f32 to vector<16x1xf32>
    %13 = arith.divf %11, %12 : vector<16x1xf32>
    %14 = vector.broadcast %6 : vector<16x1xf32> to vector<16x32xf32>
    %15 = arith.subf %0, %14 : vector<16x32xf32>
    %cst_8 = arith.constant 9.99999996E-13 : f32
    %16 = vector.broadcast %cst_8 : f32 to vector<16x1xf32>
    %17 = arith.addf %13, %16 : vector<16x1xf32>
    %18 = math.rsqrt %17 : vector<16x1xf32>
    %19 = vector.broadcast %18 : vector<16x1xf32> to vector<16x32xf32>
    %20 = arith.mulf %15, %19 : vector<16x32xf32>
    %21 = vector.broadcast %1 : vector<1x32xf32> to vector<16x32xf32>
    %22 = arith.mulf %21, %20 : vector<16x32xf32>
    %23 = vector.broadcast %2 : vector<1x32xf32> to vector<16x32xf32>
    %24 = arith.addf %22, %23 : vector<16x32xf32>
    %25 = arith.truncf %24 : vector<16x32xf32> to vector<16x32xbf16>
    %c0_9 = arith.constant 0 : index
    %c0_10 = arith.constant 0 : index
    %26 = vector.load %arg10[%c0_9, %c0_10] : memref<16x32xbf16, #tpu.memory_space<vmem>>, vector<16x32xbf16>
    tpu.vector_store %arg10[%c0_9, %c0_10], %25 {strides = array<i32>} : memref<16x32xbf16, #tpu.memory_space<vmem>>, vector<16x32xbf16>,
    %c0_11 = arith.constant 0 : index
    %c0_12 = arith.constant 0 : index
    %27 = vector.load %arg4[%c0_11, %c0_12] : memref<32x32xbf16, #tpu.memory_space<vmem>>, vector<32x32xbf16>
    %cst_13 = arith.constant dense<0.000000e+00> : vector<16x32xf32>
    %28 = tpu.matmul %25, %27, %cst_13 {dimension_numbers = #tpu.dot_dimension_numbers<[1], [0], [0], [1], [0, 0, 1, 1], [], []>} : vector<16x32xbf16>, vector<32x32xbf16>, vector<16x32xf32> -> vector<16x32xf32>
    %c0_14 = arith.constant 0 : index
    %c0_15 = arith.constant 0 : index
    %29 = vector.load %arg7[%c0_14, %c0_15] : memref<1x32xf32, #tpu.memory_space<vmem>>, vector<1x32xf32>
    %30 = vector.broadcast %29 : vector<1x32xf32> to vector<16x32xf32>
    %31 = arith.addf %28, %30 : vector<16x32xf32>
    %32 = arith.truncf %31 : vector<16x32xf32> to vector<16x32xbf16>
    %c0_16 = arith.constant 0 : index
    %c0_17 = arith.constant 0 : index
    %33 = vector.load %arg5[%c0_16, %c0_17] : memref<32x32xbf16, #tpu.memory_space<vmem>>, vector<32x32xbf16>
    %cst_18 = arith.constant dense<0.000000e+00> : vector<16x32xf32>
    %34 = tpu.matmul %25, %33, %cst_18 {dimension_numbers = #tpu.dot_dimension_numbers<[1], [0], [0], [1], [0, 0, 1, 1], [], []>} : vector<16x32xbf16>, vector<32x32xbf16>, vector<16x32xf32> -> vector<16x32xf32>
    %c0_19 = arith.constant 0 : index
    %c0_20 = arith.constant 0 : index
    %35 = vector.load %arg8[%c0_19, %c0_20] : memref<1x32xf32, #tpu.memory_space<vmem>>, vector<1x32xf32>
    %36 = vector.broadcast %35 : vector<1x32xf32> to vector<16x32xf32>
    %37 = arith.addf %34, %36 : vector<16x32xf32>
    %38 = arith.truncf %37 : vector<16x32xf32> to vector<16x32xbf16>
    %c0_21 = arith.constant 0 : index
    %c0_22 = arith.constant 0 : index
    %39 = vector.load %arg6[%c0_21, %c0_22] : memref<32x32xbf16, #tpu.memory_space<vmem>>, vector<32x32xbf16>
    %cst_23 = arith.constant dense<0.000000e+00> : vector<16x32xf32>
    %40 = tpu.matmul %25, %39, %cst_23 {dimension_numbers = #tpu.dot_dimension_numbers<[1], [0], [0], [1], [0, 0, 1, 1], [], []>} : vector<16x32xbf16>, vector<32x32xbf16>, vector<16x32xf32> -> vector<16x32xf32>
    %c0_24 = arith.constant 0 : index
    %c0_25 = arith.constant 0 : index
    %41 = vector.load %arg9[%c0_24, %c0_25] : memref<1x32xf32, #tpu.memory_space<vmem>>, vector<1x32xf32>
    %42 = vector.broadcast %41 : vector<1x32xf32> to vector<16x32xf32>
    %43 = arith.addf %40, %42 : vector<16x32xf32>
    %44 = arith.truncf %43 : vector<16x32xf32> to vector<16x32xbf16>
    %c0_26 = arith.constant 0 : index
    %c0_27 = arith.constant 0 : index
    %45 = vector.load %arg11[%c0_26, %c0_27] : memref<16x32xbf16, #tpu.memory_space<vmem>>, vector<16x32xbf16>
    tpu.vector_store %arg11[%c0_26, %c0_27], %32 {strides = array<i32>} : memref<16x32xbf16, #tpu.memory_space<vmem>>, vector<16x32xbf16>,
    %c0_28 = arith.constant 0 : index
    %c0_29 = arith.constant 0 : index
    %46 = vector.load %arg12[%c0_28, %c0_29] : memref<16x32xbf16, #tpu.memory_space<vmem>>, vector<16x32xbf16>
    tpu.vector_store %arg12[%c0_28, %c0_29], %38 {strides = array<i32>} : memref<16x32xbf16, #tpu.memory_space<vmem>>, vector<16x32xbf16>,
    %c0_30 = arith.constant 0 : index
    %c0_31 = arith.constant 0 : index
    %47 = vector.load %arg13[%c0_30, %c0_31] : memref<16x32xbf16, #tpu.memory_space<vmem>>, vector<16x32xbf16>
    tpu.vector_store %arg13[%c0_30, %c0_31], %44 {strides = array<i32>} : memref<16x32xbf16, #tpu.memory_space<vmem>>, vector<16x32xbf16>,
    return
  }
  func.func @transform_0(%arg0: i32) -> (i32, i32) {
    %c0_i32 = arith.constant 0 : i32
    %c0_i32_0 = arith.constant 0 : i32
    return %arg0, %c0_i32 : i32, i32
  }
  func.func @transform_1(%arg0: i32) -> (i32, i32) {
    %c0_i32 = arith.constant 0 : i32
    %c0_i32_0 = arith.constant 0 : i32
    %c0_i32_1 = arith.constant 0 : i32
    return %c0_i32, %c0_i32_0 : i32, i32
  }
  func.func @transform_2(%arg0: i32) -> (i32, i32) {
    %c0_i32 = arith.constant 0 : i32
    %c0_i32_0 = arith.constant 0 : i32
    %c0_i32_1 = arith.constant 0 : i32
    return %c0_i32, %c0_i32_0 : i32, i32
  }
  func.func @transform_3(%arg0: i32) -> (i32, i32) {
    %c0_i32 = arith.constant 0 : i32
    %c0_i32_0 = arith.constant 0 : i32
    %c0_i32_1 = arith.constant 0 : i32
    return %c0_i32, %c0_i32_0 : i32, i32
  }
  func.func @transform_4(%arg0: i32) -> (i32, i32) {
    %c0_i32 = arith.constant 0 : i32
    %c0_i32_0 = arith.constant 0 : i32
    %c0_i32_1 = arith.constant 0 : i32
    return %c0_i32, %c0_i32_0 : i32, i32
  }
  func.func @transform_5(%arg0: i32) -> (i32, i32) {
    %c0_i32 = arith.constant 0 : i32
    %c0_i32_0 = arith.constant 0 : i32
    %c0_i32_1 = arith.constant 0 : i32
    return %c0_i32, %c0_i32_0 : i32, i32
  }
  func.func @transform_6(%arg0: i32) -> (i32, i32) {
    %c0_i32 = arith.constant 0 : i32
    %c0_i32_0 = arith.constant 0 : i32
    %c0_i32_1 = arith.constant 0 : i32
    return %c0_i32, %c0_i32_0 : i32, i32
  }
  func.func @transform_7(%arg0: i32) -> (i32, i32) {
    %c0_i32 = arith.constant 0 : i32
    %c0_i32_0 = arith.constant 0 : i32
    %c0_i32_1 = arith.constant 0 : i32
    return %c0_i32, %c0_i32_0 : i32, i32
  }
  func.func @transform_8(%arg0: i32) -> (i32, i32) {
    %c0_i32 = arith.constant 0 : i32
    %c0_i32_0 = arith.constant 0 : i32
    %c0_i32_1 = arith.constant 0 : i32
    return %c0_i32, %c0_i32_0 : i32, i32
  }
  func.func @transform_9(%arg0: i32) -> (i32, i32) {
    %c0_i32 = arith.constant 0 : i32
    %c0_i32_0 = arith.constant 0 : i32
    return %arg0, %c0_i32 : i32, i32
  }
  func.func @transform_10(%arg0: i32) -> (i32, i32) {
    %c0_i32 = arith.constant 0 : i32
    %c0_i32_0 = arith.constant 0 : i32
    return %arg0, %c0_i32 : i32, i32
  }
  func.func @transform_11(%arg0: i32) -> (i32, i32) {
    %c0_i32 = arith.constant 0 : i32
    %c0_i32_0 = arith.constant 0 : i32
    return %arg0, %c0_i32 : i32, i32
  }
  func.func @transform_12(%arg0: i32) -> (i32, i32) {
    %c0_i32 = arith.constant 0 : i32
    %c0_i32_0 = arith.constant 0 : i32
    return %arg0, %c0_i32 : i32, i32
  }
}

</mosaic_0001>

<bundles_post_ra>
// kernel: tpu_custom_call.1
= control target key start
LH: loop header
LB: loop body
LE: loop exit
PB: predicated region body
PF: predicated region fallthrough
CT: control target
= control target key end

     0   :  { %18 = vsyncpa [#allocation3], 0  ;;  %s861_s0 = inlined_call_operand.hbm [shape: f32[16,32], index: 0, kind: input, shape index: {}]   ;;  %s862_s1 = inlined_call_operand.vmem [shape: f32[1,32], index: 1, kind: input, shape index: {}]   ;;  %s863_s2 = inlined_call_operand.vmem [shape: f32[1,32], index: 2, kind: input, shape index: {}]   ;;  %s864_s3 = inlined_call_operand.hbm [shape: bf16[32,32], index: 3, kind: input, shape index: {}]   ;;  %s865_s4 = inlined_call_operand.hbm [shape: bf16[32,32], index: 4, kind: input, shape index: {}]   ;;  %s866_s5 = inlined_call_operand.hbm [shape: bf16[32,32], index: 5, kind: input, shape index: {}]   ;;  %s867_s6 = inlined_call_operand.vmem [shape: f32[1,32], index: 6, kind: input, shape index: {}]   ;;  %s868_s7 = inlined_call_operand.vmem [shape: f32[1,32], index: 7, kind: input, shape index: {}]   ;;  %s869_s8 = inlined_call_operand.vmem [shape: f32[1,32], index: 8, kind: input, shape index: {}]   ;;  %s870_s9 = inlined_call_operand.hbm [shape: bf16[16,32], index: 9, kind: output, shape index: {0}]   ;;  %s871_s10 = inlined_call_operand.hbm [shape: bf16[16,32], index: 10, kind: output, shape index: {1}]   ;;  %s872_s11 = inlined_call_operand.hbm [shape: bf16[16,32], index: 11, kind: output, shape index: {2}]   ;;  %s873_s12 = inlined_call_operand.hbm [shape: bf16[16,32], index: 12, kind: output, shape index: {3}]  }
   0x1   :  { %19 = vsyncpa [#allocation6], 0 }
   0x2   :  { %20 = vsyncpa [#allocation9], 0 }
   0x3   :  { %21 = vsyncpa [#allocation4], 0 }
   0x4   :  { %22 = vsyncpa [#allocation12], 0 }
   0x5   :  { %23 = vsyncpa [#allocation15], 0  ;;  %s704_s21 = smov [#allocation5]  }
   0x6   :  { %s45_s22 = sshll.u32 %s704_s21, 4  ;;  %s46_s22 = int_to_ptr.vmem [resolvable:$true] %s45_s22 }
   0x7   :  { %s540_s23 = scalar_lea.vmem %s46_s22, 256  ;;  %p545_p1 = scmp.lt.s32.totalorder %s46_s22, %s46_s22 }
   0x8   :  { %p541_p0 = scmp.ne.s32.totalorder %s46_s22, %s540_s23  ;;  %p546_p2 = scmp.lt.s32.totalorder %s540_s23, %s540_s23 }
   0xa   :  { %p547_p3 = por %p546_p2, %p545_p1 }
   0xc   :  { %p548_p4 = pnand %p547_p3, %p541_p0 }
   0xe   :  { %551 = shalt.err (!%p548_p4)
}
   0xf   :  { %s705_s24 = smov 64   ;;  %s706_s25 = smov 4  }
  0x10   :  { %51 = dma.hbm_to_vmem [thread:$0]  %s864_s3, 256, %s46_s22, [#allocation6], %s705_s24, %s705_s24, %s706_s25  }
  0x11   :  { %s707_s28 = smov [#allocation2]  }
  0x12   :  { %s29_s29 = sshll.u32 %s707_s28, 4  ;;  %s30_s29 = int_to_ptr.vmem [resolvable:$true] %s29_s29 }
  0x13   :  { %s560_s30 = scalar_lea.vmem %s30_s29, 256  ;;  %p565_p6 = scmp.lt.s32.totalorder %s30_s29, %s30_s29 }
  0x14   :  { %p561_p5 = scmp.ne.s32.totalorder %s30_s29, %s560_s30  ;;  %p566_p7 = scmp.lt.s32.totalorder %s560_s30, %s560_s30 }
  0x16   :  { %p567_p8 = por %p566_p7, %p565_p6 }
  0x18   :  { %p568_p9 = pnand %p567_p8, %p561_p5 }
  0x1a   :  { %571 = shalt.err (!%p568_p9)
}
  0x1b   :  { %s708_s13 = smov 128   ;;  %s709_s14 = smov 8  }
  0x1c   :  { %35 = dma.hbm_to_vmem [thread:$0]  %s861_s0, 256, %s30_s29, [#allocation3], %s708_s13, %s708_s13, %s709_s14  }
  0x1d   :  { %s710_s17 = smov [#allocation7]   ;;  %s711_s19 = smov [#allocation8]  }
  0x1e   :  { %s57_s18 = sshll.u32 %s710_s17, 4  ;;  %s69_s3 = sshll.u32 %s711_s19, 4  ;;  %s58_s18 = int_to_ptr.vmem [resolvable:$true] %s57_s18  ;;  %s70_s3 = int_to_ptr.vmem [resolvable:$true] %s69_s3 }
  0x1f   :  { %s580_s20 = scalar_lea.vmem %s58_s18, 256  ;;  %p585_p11 = scmp.lt.s32.totalorder %s58_s18, %s58_s18 }
  0x20   :  { %p581_p10 = scmp.ne.s32.totalorder %s58_s18, %s580_s20  ;;  %p586_p12 = scmp.lt.s32.totalorder %s580_s20, %s580_s20 }
  0x22   :  { %p587_p13 = por %p586_p12, %p585_p11 }
  0x24   :  { %p588_p0 = pnand %p587_p13, %p581_p10 }
  0x26   :  { %591 = shalt.err (!%p588_p0)
}
  0x27   :  { %63 = dma.hbm_to_vmem [thread:$0]  %s865_s4, 256, %s58_s18, [#allocation6], %s705_s24, %s705_s24, %s706_s25  }
  0x28   :  { %s600_s0 = scalar_lea.vmem %s70_s3, 256  ;;  %p605_p2 = scmp.lt.s32.totalorder %s70_s3, %s70_s3 }
  0x29   :  { %p601_p1 = scmp.ne.s32.totalorder %s70_s3, %s600_s0  ;;  %p606_p3 = scmp.lt.s32.totalorder %s600_s0, %s600_s0 }
  0x2b   :  { %p607_p4 = por %p606_p3, %p605_p2 }
  0x2d   :  { %p608_p5 = pnand %p607_p4, %p601_p1 }
  0x2f   :  { %611 = shalt.err (!%p608_p5)
}
  0x30   :  { %75 = dma.hbm_to_vmem [thread:$0]  %s866_s5, 256, %s70_s3, [#allocation9], %s705_s24, %s705_s24, %s706_s25  }
  0x31   :  { %692 = dma.done.wait [#allocation3], 256  }
  0x32   :  { %693 = vsyncadd [#allocation3], 4294967040 }
  0x33   :  { %694 = dma.done.wait [#allocation6], 512  }
  0x34   :  { %695 = vsyncadd [#allocation6], 4294966784 }
  0x35   :  { %696 = dma.done.wait [#allocation9], 256  }
  0x36   :  { %697 = vsyncadd [#allocation9], 4294967040  ;;  %vm99_vm0 = vcmask 261120   ;;  %v95_v0 = vld [vmem:[#allocation2] sm:$0xff]  ;;  %v96_v1 = vld [vmem:[#allocation2 + $0x8] sm:$0xff]  ;;  %v712_v16 = vmov 0.0  }
  0x37   :  { %v100_v2 = vsel %vm99_vm0, %v95_v0, 0.0  ;;  %v103_v3 = vsel %vm99_vm0, %v96_v1, 0.0  ;;  %v522_v14 = vld [vmem:[#allocation5 + $0x8] sm:$0xff]   ;;  %v523_v15 = vld [vmem:[#allocation7 + $0x8] sm:$0xff]   ;;  %484 = vmatprep.subr.bf16.mxu0 %v712_v16  ;;  %492 = vmatprep.subr.bf16.mxu1 %v712_v16  ;;  %v524_v17 = vld [vmem:[#allocation5] sm:$0xff]   ;;  %vm713_vm1 = vmmov 0  }
  0x38   :  { %101 = vadd.xlane.f32.xlu0 %v100_v2  ;;  %485 = vmatpush3.bf16.msra.mxu0 %v522_v14  ;;  %v525_v18 = vld [vmem:[#allocation7] sm:$0xff]   ;;  %vm151_vm2 = vcmask 257024   ;;  %v526_v36 = vld [vmem:[#allocation8 + $0x8] sm:$0xff]   ;;  %v527_v39 = vld [vmem:[#allocation8] sm:$0xff]  }
  0x39   :  { %493 = vmatpush3.bf16.msra.mxu1 %v523_v15  ;;  %486 = vmatprep.subr.bf16.mxu0 %v712_v16  ;;  %v445_v26 = vld [vmem:[%s862_s1] ss:$0 sm:$0xff]  ;;  %s714_s1 = smov [#allocation10]  }
  0x3a   :  { %494 = vmatprep.subr.bf16.mxu1 %v712_v16  ;;  %488 = vmatprep.mubr.msk.bf16.mxu0 %vm713_vm1, %v712_v16  ;;  %v446_v28 = vld [vmem:[%s863_s2] ss:$0 sm:$0xff]  ;;  %s384_s2 = sshll.u32 %s714_s1, 4  ;;  %s385_s2 = int_to_ptr.vmem [resolvable:$true] %s384_s2 }
  0x3b   :  { %496 = vmatprep.mubr.msk.bf16.mxu1 %vm713_vm1, %v712_v16  ;;  %s612_s29 = scalar_lea.vmem %s385_s2, 128  ;;  %p617_p7 = scmp.lt.s32.totalorder %s385_s2, %s385_s2 }
  0x3c   :  { %104 = vadd.xlane.f32.xlu0 %v103_v3  ;;  %487 = vmatpush3.bf16.msra.mxu0 %v524_v17  ;;  %p613_p6 = scmp.ne.s32.totalorder %s385_s2, %s612_s29  ;;  %p618_p8 = scmp.lt.s32.totalorder %s612_s29, %s612_s29 }
  0x3d   :  { %495 = vmatpush3.bf16.msra.mxu1 %v525_v18  ;;  %500 = vmatprep.subr.bf16.mxu0 %v712_v16 }
  0x3e   :  { %p619_p9 = por %p618_p8, %p617_p7 }
  0x40   :  { %p620_p10 = pnand %p619_p9, %p613_p6 }
  0xc1   :  { %v102_v4 = vpop.xlane.xlu0 %101 }
  0xc2   :  { %v107_v5 = vmul.f32 0.03125, %v102_v4 }
  0xc4   :  { %v109_v6 = vsub.f32 %v95_v0, %v107_v5 }
  0xc5   :  { %v105_v7 = vpop.xlane.xlu0 %104 }
  0xc6   :  { %v108_v8 = vmul.f32 0.03125, %v105_v7  ;;  %v111_v9 = vmul.f32 %v109_v6, %v109_v6 }
  0xc8   :  { %v110_v10 = vsub.f32 %v96_v1, %v108_v8  ;;  %v113_v11 = vsel %vm99_vm0, %v111_v9, 0.0 }
  0xc9   :  { %114 = vadd.xlane.f32.xlu1 %v113_v11 }
  0xca   :  { %v112_v12 = vmul.f32 %v110_v10, %v110_v10 }
  0xcc   :  { %v116_v13 = vsel %vm99_vm0, %v112_v12, 0.0 }
  0xcd   :  { %117 = vadd.xlane.f32.xlu1 %v116_v13 }
 0x152   :  { %v115_v19 = vpop.xlane.xlu1 %114 }
 0x153   :  { %v119_v20 = vmul.f32 0.03125, %v115_v19 }
 0x155   :  { %v121_v21 = vadd.f32 1e-12, %v119_v20 }
 0x156   :  { %v118_v22 = vpop.xlane.xlu1 %117 }
 0x157   :  { %528 = vrsqrt.f32 %v121_v21  ;;  %v120_v23 = vmul.f32 0.03125, %v118_v22 }
 0x159   :  { %v122_v24 = vadd.f32 1e-12, %v120_v23 }
 0x15b   :  { %530 = vrsqrt.f32 %v122_v24 }
 0x164   :  { %v529_v25 = vpop.eup %528 }
 0x165   :  { %v125_v27 = vmul.f32 %v529_v25, %v109_v6 }
 0x167   :  { %v133_v29 = vmul.f32 %v445_v26, %v125_v27 }
 0x168   :  { %v531_v30 = vpop.eup %530 }
 0x169   :  { %v126_v31 = vmul.f32 %v531_v30, %v110_v10  ;;  %v141_v32 = vadd.f32 %v446_v28, %v133_v29 }
 0x16b   :  { %v134_v33 = vmul.f32 %v445_v26, %v126_v31  ;;  %v467_v34 = vpack.c.bf16 %v141_v32, %v141_v32 }
 0x16d   :  { %v142_v35 = vadd.f32 %v446_v28, %v134_v33  ;;  %152 = vst.msk [vmem:[#allocation10] sm:$0xf] %vm151_vm2, %v467_v34 }
 0x16f   :  { %v143_v37 = vpack.c.bf16 %v142_v35, %v141_v32  ;;  %v468_v38 = vpack.c.bf16 %v142_v35, %v142_v35 }
 0x171   :  { %489 = vmatmul.mubr.msk.bf16.vlgmr.msra.gmra.mxu0 %vm99_vm0, %v143_v37  ;;  %497 = vmatmul.mubr.msk.bf16.vlgmr.msra.gmra.mxu1 %vm99_vm0, %v143_v37  ;;  %153 = vst.msk [vmem:[#allocation10 + $0x4] sm:$0xf] %vm151_vm2, %v468_v38 }
 0x172   :  { %501 = vmatpush3.bf16.msra.mxu0 %v526_v36  ;;  %504 = vmatprep.mubr.msk.bf16.mxu0 %vm713_vm1, %v712_v16 }
 0x173   :  { %502 = vmatprep.subr.bf16.mxu0 %v712_v16 }
 0x176   :  { %503 = vmatpush3.bf16.msra.mxu0 %v527_v39 }
 0x179   :  { %505 = vmatmul.mubr.msk.bf16.vlgmr.msra.gmra.mxu0 %vm99_vm0, %v143_v37 }
 0x17a   :  { %623 = shalt.err (!%p620_p10)
}
 0x17b   :  { %390 = dma.vmem_to_hbm [thread:$0]  %s385_s2, 128, %s870_s9, [#allocation4], %s705_s24, %s705_s24, %s706_s25  }
 0x17c   :  { %v449_v40 = vld [vmem:[%s867_s6] ss:$0 sm:$0xff]  ;;  %s715_s18 = smov [#allocation11]   ;;  %s716_s6 = smov [#allocation13]  }
 0x17d   :  { %v453_v41 = vld [vmem:[%s868_s7] ss:$0 sm:$0xff]  ;;  %s396_s9 = sshll.u32 %s715_s18, 4  ;;  %s408_s7 = sshll.u32 %s716_s6, 4  ;;  %s397_s9 = int_to_ptr.vmem [resolvable:$true] %s396_s9  ;;  %s409_s7 = int_to_ptr.vmem [resolvable:$true] %s408_s7 }
 0x17e   :  { %v457_v56 = vld [vmem:[%s869_s8] ss:$0 sm:$0xff]  ;;  %s632_s20 = scalar_lea.vmem %s397_s9, 128  ;;  %p637_p12 = scmp.lt.s32.totalorder %s397_s9, %s397_s9 }
 0x17f   :  { %p633_p11 = scmp.ne.s32.totalorder %s397_s9, %s632_s20  ;;  %p638_p13 = scmp.lt.s32.totalorder %s632_s20, %s632_s20 }
 0x181   :  { %p639_p0 = por %p638_p13, %p637_p12 }
 0x183   :  { %p640_p1 = pnand %p639_p0, %p633_p11 }
 0x231   :  { %v214_v42 = vpop.f32.mrf.mxu0  ;;  %v279_v43 = vpop.f32.mrf.mxu1 }
 0x232   :  { %v215_v44 = vadd.f32 %v449_v40, %v214_v42  ;;  %v280_v45 = vadd.f32 %v453_v41, %v279_v43 }
 0x233   :  { %v490_v46 = vpop.f32.mrf.mxu0  ;;  %v498_v47 = vpop.f32.mrf.mxu1 }
 0x234   :  { %v469_v48 = vpack.c.bf16 %v215_v44, %v215_v44  ;;  %v471_v49 = vpack.c.bf16 %v280_v45, %v280_v45 }
 0x235   :  { %v217_v50 = vpop.f32.mrf.mxu0  ;;  %v282_v51 = vpop.f32.mrf.mxu1 }
 0x236   :  { %368 = vst.msk [vmem:[#allocation13] sm:$0xf] %vm151_vm2, %v471_v49  ;;  %359 = vst.msk [vmem:[#allocation11] sm:$0xf] %vm151_vm2, %v469_v48  ;;  %v218_v52 = vadd.f32 %v449_v40, %v217_v50  ;;  %v283_v53 = vadd.f32 %v453_v41, %v282_v51 }
 0x237   :  { %v491_v54 = vpop.f32.mrf.mxu0  ;;  %v499_v55 = vpop.f32.mrf.mxu1 }
 0x238   :  { %v470_v57 = vpack.c.bf16 %v218_v52, %v218_v52  ;;  %v472_v58 = vpack.c.bf16 %v283_v53, %v283_v53 }
 0x239   :  { %v344_v59 = vpop.f32.mrf.mxu0 }
 0x23a   :  { %360 = vst.msk [vmem:[#allocation11 + $0x4] sm:$0xf] %vm151_vm2, %v470_v57  ;;  %369 = vst.msk [vmem:[#allocation13 + $0x4] sm:$0xf] %vm151_vm2, %v472_v58  ;;  %v345_v60 = vadd.f32 %v457_v56, %v344_v59 }
 0x23b   :  { %v506_v61 = vpop.f32.mrf.mxu0 }
 0x23c   :  { %643 = shalt.err (!%p640_p1)
}
 0x23d   :  { %402 = dma.vmem_to_hbm [thread:$0]  %s397_s9, 128, %s871_s10, [#allocation12], %s705_s24, %s705_s24, %s706_s25   ;;  %v473_v62 = vpack.c.bf16 %v345_v60, %v345_v60 }
 0x23e   :  { %s652_s22 = scalar_lea.vmem %s409_s7, 128  ;;  %p657_p3 = scmp.lt.s32.totalorder %s409_s7, %s409_s7 }
 0x23f   :  { %p653_p2 = scmp.ne.s32.totalorder %s409_s7, %s652_s22  ;;  %p658_p4 = scmp.lt.s32.totalorder %s652_s22, %s652_s22 }
 0x241   :  { %p659_p5 = por %p658_p4, %p657_p3 }
 0x243   :  { %p660_p6 = pnand %p659_p5, %p653_p2 }
 0x245   :  { %663 = shalt.err (!%p660_p6)
}
 0x246   :  { %414 = dma.vmem_to_hbm [thread:$0]  %s409_s7, 128, %s872_s11, [#allocation12], %s705_s24, %s705_s24, %s706_s25   ;;  %v347_v63 = vpop.f32.mrf.mxu0  ;;  %377 = vst.msk [vmem:[#allocation14] sm:$0xf] %vm151_vm2, %v473_v62 }
 0x247   :  { %s717_s26 = smov [#allocation14]   ;;  %v348_v0 = vadd.f32 %v457_v56, %v347_v63 }
 0x248   :  { %s420_s4 = sshll.u32 %s717_s26, 4  ;;  %v507_v1 = vpop.f32.mrf.mxu0  ;;  %s421_s4 = int_to_ptr.vmem [resolvable:$true] %s420_s4 }
 0x249   :  { %v474_v2 = vpack.c.bf16 %v348_v0, %v348_v0  ;;  %s672_s10 = scalar_lea.vmem %s421_s4, 128  ;;  %p677_p8 = scmp.lt.s32.totalorder %s421_s4, %s421_s4 }
 0x24a   :  { %p673_p7 = scmp.ne.s32.totalorder %s421_s4, %s672_s10  ;;  %p678_p9 = scmp.lt.s32.totalorder %s672_s10, %s672_s10 }
 0x24b   :  { %378 = vst.msk [vmem:[#allocation14 + $0x4] sm:$0xf] %vm151_vm2, %v474_v2 }
 0x24c   :  { %p679_p10 = por %p678_p9, %p677_p8 }
 0x24e   :  { %p680_p11 = pnand %p679_p10, %p673_p7 }
 0x250   :  { %683 = shalt.err (!%p680_p11)
}
 0x251   :  { %426 = dma.vmem_to_hbm [thread:$0]  %s421_s4, 128, %s873_s12, [#allocation15], %s705_s24, %s705_s24, %s706_s25  }
 0x252   :  { %698 = dma.done.wait [#allocation4], 128  }
 0x253   :  { %699 = vsyncadd [#allocation4], 4294967168 }
 0x254   :  { %700 = dma.done.wait [#allocation12], 256  }
 0x255   :  { %701 = vsyncadd [#allocation12], 4294967040 }
 0x256   :  { %702 = dma.done.wait [#allocation15], 128  }
 0x257   :  { %703 = vsyncadd [#allocation15], 4294967168 }
 0x258   :  { %439 = vsyncpa [#allocation3], 1 }
 0x259   :  { %440 = vsyncpa [#allocation6], 1 }
 0x25a   :  { %441 = vsyncpa [#allocation9], 1 }
 0x25b   :  { %442 = vsyncpa [#allocation4], 1 }
 0x25c   :  { %443 = vsyncpa [#allocation12], 1 }
 0x25d   :  { %444 = vsyncpa [#allocation15], 1 }

</bundles_post_ra>
